<compile_context>
chip_gen: v7x
topology: tpu7x:2x2x1
jax: 0.10.0
libtpu: 0.0.40
codegen_flags: <defaults>
</compile_context>

<pallas_src>
import jax
import jax.numpy as jnp
from jax import lax
from jax.experimental import pallas as pl
from jax.experimental.pallas import tpu as pltpu

# Stand-in for cfg.MODEL.TRANSFORMER.TRAVERSALS (only its length matters).
TRAVERSALS = ("preorder", "inlcrs", "postorder")


def _round_up(a, b):
    return ((a + b - 1) // b) * b


def _make_kernel(d_pad, s_pad, pe_dims, offs, n_trav, compute_dtype, kc, narrow):
    """out_tile = x_tile + sum_i onehot(idx_tile[:, i]) @ band_i(fused_table)."""
    n_full = s_pad // kc
    rem = s_pad - n_full * kc

    def kernel(x_ref, idx_ref, tab_ref, o_ref):
        idx = idx_ref[...]                                   # (rt, T) int32
        rt = idx.shape[0]

        def chunk_dot(band, c0_rel, ck, idx_col, col0, width, acc):
            start = band * s_pad + c0_rel                    # band base + intra-band offset
            if not isinstance(start, int):                   # traced (fori_loop) index
                start = pl.multiple_of(start, 8)             # s_pad, kc are multiples of 8
            iota = c0_rel + lax.broadcasted_iota(jnp.int32, (rt, ck), 1)
            onehot = (iota == idx_col).astype(compute_dtype)  # bool cast, no where/select
            tab = tab_ref[pl.ds(start, ck), pl.ds(col0, width)]
            return acc + jnp.dot(onehot, tab, preferred_element_type=jnp.float32)

        def band_sum(band, col0, width, acc):
            idx_col = idx[:, band:band + 1]                  # (rt, 1): single compare / band
            if n_full <= 4:                                  # short: full unroll
                for j in range(n_full):
                    acc = chunk_dot(band, j * kc, kc, idx_col, col0, width, acc)
            else:                                            # long: keep live ranges tight
                acc = lax.fori_loop(
                    0, n_full,
                    lambda j, a: chunk_dot(band, j * kc, kc, idx_col, col0, width, a),
                    acc)
            if rem:                                          # static remainder chunk
                acc = chunk_dot(band, n_full * kc, rem, idx_col, col0, width, acc)
            return acc

        if narrow:
            # All pe_dims are multiples of 128: contract only each band's column slice
            # (avoids the T x redundant zero-column MXU FLOPs of the block-diag table).
            parts = []
            for i in range(n_trav):
                z = jnp.zeros((rt, pe_dims[i]), jnp.float32)
                parts.append(band_sum(i, offs[i], pe_dims[i], z))
            pe = jnp.concatenate(parts, axis=-1)
            o_ref[...] = (x_ref[...].astype(jnp.float32) + pe).astype(o_ref.dtype)
        else:
            # Seed the accumulator with x: no separate full-width x copy stays live
            # across the contraction and no extra final add.
            acc = x_ref[...].astype(jnp.float32)
            for i in range(n_trav):
                acc = band_sum(i, 0, d_pad, acc)
            o_ref[...] = acc.astype(o_ref.dtype)

    return kernel


def make_swat_pe_params(key, d_model, seq_len, n_traversals, pe_dtype=jnp.bfloat16):
    """Init-time params: raw N(0,1) tables (nn.Embedding default init) plus the fused
    block-diagonal table used by the kernel, built ONCE here (not per forward call)."""
    pe_dim = [d_model // n_traversals for _ in range(n_traversals)]
    pe_dim[-1] = d_model - pe_dim[0] * (n_traversals - 1)

    tables = []
    for dim in pe_dim:
        key, sub = jax.random.split(key)
        tables.append(jax.random.normal(sub, (seq_len, dim), dtype=jnp.float32))

    s_pad = _round_up(seq_len, 8)           # 8-aligned bands -> aligned in-kernel slices
    d_pad = _round_up(d_model, 128)         # lane-dense output / full MXU N utilization
    fused = jnp.zeros((n_traversals * s_pad, d_pad), dtype=pe_dtype)
    offs, off = [], 0
    for i, t in enumerate(tables):
        offs.append(off)
        fused = fused.at[i * s_pad:i * s_pad + seq_len, off:off + pe_dim[i]].set(
            t.astype(pe_dtype))
        off += pe_dim[i]

    return {
        "tables": tables,                    # raw tables (reference / training)
        "fused": fused,                      # (T*S_pad, D_pad) block-diagonal, pe_dtype
        "pe_dims": tuple(pe_dim),
        "offsets": tuple(offs),
        "seq_len": seq_len,
        "d_model": d_model,
    }


def swat_pe_encoder(params, x, indexes, *, row_tile=None, k_chunk=512,
                    vmem_budget_bytes=None):
    """x: (S, B, D) float; indexes: (S, B, T) int; params from make_swat_pe_params."""
    S, B, D = x.shape
    T = indexes.shape[-1]
    pe_dims = params["pe_dims"]
    offs = params["offsets"]
    fused = params["fused"]
    assert len(pe_dims) == T and sum(pe_dims) == D == params["d_model"]

    s_pad = fused.shape[0] // T
    d_pad = fused.shape[1]
    pe_dtype = fused.dtype
    N = S * B
    narrow = (T > 1) and all(d % 128 == 0 for d in pe_dims)

    # ---- chip-aware VMEM budget (v7x has 64 MiB, v5e/v6e have 128 MiB) -------------
    kind = ""
    try:
        kind = jax.devices()[0].device_kind.lower()
    except Exception:
        pass
    is_v7 = ("v7" in kind) or ("7x" in kind)
    if vmem_budget_bytes is None:
        vmem_budget_bytes = (40 << 20) if is_v7 else (90 << 20)
    vmem_cap = (56 << 20) if is_v7 else (100 << 20)

    x_item = jnp.dtype(x.dtype).itemsize
    pe_item = jnp.dtype(pe_dtype).itemsize
    kc = max(8, (min(int(k_chunk), s_pad) // 8) * 8)         # band-internal chunk, 8-aligned

    def table_bytes(bufs):
        return bufs * T * s_pad * d_pad * pe_item

    def tile_bytes(rt):
        streamed = 2 * (rt * d_pad * x_item +                # x tile (double buffered)
                        rt * d_pad * x_item +                # out tile
                        rt * T * 4)                          # index tile
        temps = (rt * d_pad * 4 +                            # f32 accumulator
                 rt * kc * 4 +                               # int32 iota
                 rt * kc * 4 +                               # bool match (vreg-width bound)
                 rt * kc * pe_item)                          # one-hot matmul operand
        return streamed + temps

    single_buf_table = hasattr(pl, "Buffered")               # constant block -> 1 buffer
    tb_pick = table_bytes(1 if single_buf_table else 2)

    if row_tile is None:
        row_tile = 8
        for cand in (1024, 512, 256, 128, 64, 32, 16, 8):
            if tb_pick + tile_bytes(cand) <= vmem_budget_bytes:
                row_tile = cand
                break
    row_tile = max(8, (int(row_tile) // 8) * 8)
    # Keep >= ~8 grid steps: both v7x TensorCores get work and DMA/compute overlap.
    row_tile = min(row_tile, max(8, _round_up(pl.cdiv(N, 8), 8)))

    n_pad = pl.cdiv(N, row_tile) * row_tile
    x_flat = x.reshape(N, D)
    idx_flat = indexes.reshape(N, T).astype(jnp.int32)
    if d_pad != D:
        x_flat = jnp.pad(x_flat, ((0, 0), (0, d_pad - D)))
    if n_pad != N:
        x_flat = jnp.pad(x_flat, ((0, n_pad - N), (0, 0)))
        idx_flat = jnp.pad(idx_flat, ((0, n_pad - N), (0, 0)))   # idx 0 valid; rows dropped

    # Sized so even the 2x-table fallback compiles; no artificially low hard cap.
    vmem_limit = int(max(32 << 20,
                         min(vmem_cap,
                             table_bytes(2) + tile_bytes(row_tile) + (8 << 20))))

    kernel = _make_kernel(d_pad, s_pad, pe_dims, offs, T, pe_dtype, kc, narrow)
    grid = (n_pad // row_tile,)
    ts_pad = T * s_pad

    def call(use_single_buf):
        if use_single_buf:
            tab_spec = pl.BlockSpec((ts_pad, d_pad), lambda i: (0, 0),
                                    pipeline_mode=pl.Buffered(1))
        else:
            tab_spec = pl.BlockSpec((ts_pad, d_pad), lambda i: (0, 0))
        return pl.pallas_call(
            kernel,
            out_shape=jax.ShapeDtypeStruct((n_pad, d_pad), x.dtype),
            grid=grid,
            in_specs=[
                pl.BlockSpec((row_tile, d_pad), lambda i: (i, 0)),   # x rows
                pl.BlockSpec((row_tile, T), lambda i: (i, 0)),       # index rows
                tab_spec,                                            # resident fused table
            ],
            out_specs=pl.BlockSpec((row_tile, d_pad), lambda i: (i, 0)),
            compiler_params=pltpu.CompilerParams(
                dimension_semantics=("parallel",),
                vmem_limit_bytes=vmem_limit),
        )(x_flat, idx_flat, fused)

    if single_buf_table:
        try:
            out = call(True)
        except Exception:                    # pipeline_mode unsupported -> plain 2-buffer spec
            out = call(False)
    else:
        out = call(False)

    return out[:N, :D].reshape(S, B, D)


def reference(x, indexes, tables):
    embs = [tables[i][indexes[:, :, i]] for i in range(len(tables))]
    return x + jnp.concatenate(embs, axis=-1)


if __name__ == "__main__":
    n_trav = len(TRAVERSALS)

    def run_case(seq_len, batch, d_model, k_chunk):
        key = jax.random.PRNGKey(0)
        k_x, k_idx, k_tab = jax.random.split(key, 3)
        x = jax.random.normal(k_x, (seq_len, batch, d_model), dtype=jnp.float32)
        indexes = jax.random.randint(k_idx, (seq_len, batch, n_trav), 0, seq_len,
                                     dtype=jnp.int32)
        params = make_swat_pe_params(k_tab, d_model, seq_len, n_trav)

        out = swat_pe_encoder(params, x, indexes, k_chunk=k_chunk)
        out = jax.block_until_ready(out)
        assert out.shape == (seq_len, batch, d_model)

        # Loose check vs full-f32 reference (only difference: bf16 rounding of tables).
        ref_f32 = reference(x, indexes, params["tables"])
        assert jnp.allclose(out, ref_f32, atol=5e-2, rtol=5e-2)

        # Tight check vs reference using the same bf16-rounded tables: the one-hot matmul
        # is an exact gather, so this matches to f32 precision.
        tables_q = [t.astype(jnp.bfloat16).astype(jnp.float32) for t in params["tables"]]
        ref_q = reference(x, indexes, tables_q)
        assert jnp.allclose(out, ref_q, atol=1e-5, rtol=1e-5)

    # Small shape consistent with the module (seq=8, batch=2, d_model=32): unrolled path.
    run_case(seq_len=8, batch=2, d_model=32, k_chunk=512)
    # Larger seq_len with a small k_chunk to exercise the fori_loop + remainder-chunk path.
    run_case(seq_len=88, batch=2, d_model=32, k_chunk=16)

    print("KERNEL_OK")
</pallas_src>

<mosaic_0001>
module attributes {stable_mosaic.version = 11 : i64} {
  func.func @kernel(%arg0: i32, %arg1: memref<8x128xf32, #tpu.memory_space<vmem>>, %arg2: memref<8x3xi32, #tpu.memory_space<vmem>>, %arg3: memref<24x128xbf16, #tpu.memory_space<vmem>>, %arg4: memref<8x128xf32, #tpu.memory_space<vmem>>) attributes {dimension_semantics = [#tpu.dimension_semantics<parallel>], iteration_bounds = array<i64: 2>, scalar_prefetch = 0 : i64, scratch_operands = 0 : i64, tpu.core_type = #tpu.core_type<tc>, window_params = [{transform_indices = @transform_0, window_bounds = array<i64: 8, 128>}, {transform_indices = @transform_1, window_bounds = array<i64: 8, 3>}, {pipeline_mode = #tpu.pipeline_mode<synchronous>, transform_indices = @transform_2, window_bounds = array<i64: 24, 128>}, {transform_indices = @transform_3, window_bounds = array<i64: 8, 128>}]} {
    %c0 = arith.constant 0 : index
    %c0_0 = arith.constant 0 : index
    %0 = vector.load %arg2[%c0, %c0_0] : memref<8x3xi32, #tpu.memory_space<vmem>>, vector<8x3xi32>
    %c0_1 = arith.constant 0 : index
    %c0_2 = arith.constant 0 : index
    %1 = vector.load %arg1[%c0_1, %c0_2] : memref<8x128xf32, #tpu.memory_space<vmem>>, vector<8x128xf32>
    %2 = vector.extract_strided_slice %0 {offsets = [0, 0], sizes = [8, 1], strides = [1, 1]} : vector<8x3xi32> to vector<8x1xi32>
    %3 = tpu.iota {dimensions = array<i32: 1>} : vector<8x8xi32>
    %c0_i32 = arith.constant 0 : i32
    %4 = vector.broadcast %c0_i32 : i32 to vector<8x8xi32>
    %5 = arith.addi %4, %3 : vector<8x8xi32>
    %6 = vector.broadcast %2 : vector<8x1xi32> to vector<8x8xi32>
    %7 = arith.cmpi eq, %5, %6 : vector<8x8xi32>
    %8 = arith.extui %7 : vector<8x8xi1> to vector<8x8xi32>
    %9 = arith.sitofp %8 : vector<8x8xi32> to vector<8x8xf32>
    %10 = arith.truncf %9 : vector<8x8xf32> to vector<8x8xbf16>
    %c0_3 = arith.constant 0 : index
    %c0_4 = arith.constant 0 : index
    %11 = vector.load %arg3[%c0_3, %c0_4] : memref<24x128xbf16, #tpu.memory_space<vmem>>, vector<8x128xbf16>
    %cst = arith.constant dense<0.000000e+00> : vector<8x128xf32>
    %12 = tpu.matmul %10, %11, %cst {dimension_numbers = #tpu.dot_dimension_numbers<[1], [0], [0], [1], [0, 0, 1, 1], [], []>} : vector<8x8xbf16>, vector<8x128xbf16>, vector<8x128xf32> -> vector<8x128xf32>
    %13 = arith.addf %1, %12 : vector<8x128xf32>
    %14 = vector.extract_strided_slice %0 {offsets = [0, 1], sizes = [8, 1], strides = [1, 1]} : vector<8x3xi32> to vector<8x1xi32>
    %15 = tpu.iota {dimensions = array<i32: 1>} : vector<8x8xi32>
    %c0_i32_5 = arith.constant 0 : i32
    %16 = vector.broadcast %c0_i32_5 : i32 to vector<8x8xi32>
    %17 = arith.addi %16, %15 : vector<8x8xi32>
    %18 = vector.broadcast %14 : vector<8x1xi32> to vector<8x8xi32>
    %19 = arith.cmpi eq, %17, %18 : vector<8x8xi32>
    %20 = arith.extui %19 : vector<8x8xi1> to vector<8x8xi32>
    %21 = arith.sitofp %20 : vector<8x8xi32> to vector<8x8xf32>
    %22 = arith.truncf %21 : vector<8x8xf32> to vector<8x8xbf16>
    %c8 = arith.constant 8 : index
    %c0_6 = arith.constant 0 : index
    %23 = vector.load %arg3[%c8, %c0_6] : memref<24x128xbf16, #tpu.memory_space<vmem>>, vector<8x128xbf16>
    %cst_7 = arith.constant dense<0.000000e+00> : vector<8x128xf32>
    %24 = tpu.matmul %22, %23, %cst_7 {dimension_numbers = #tpu.dot_dimension_numbers<[1], [0], [0], [1], [0, 0, 1, 1], [], []>} : vector<8x8xbf16>, vector<8x128xbf16>, vector<8x128xf32> -> vector<8x128xf32>
    %25 = arith.addf %13, %24 : vector<8x128xf32>
    %26 = vector.extract_strided_slice %0 {offsets = [0, 2], sizes = [8, 1], strides = [1, 1]} : vector<8x3xi32> to vector<8x1xi32>
    %27 = tpu.iota {dimensions = array<i32: 1>} : vector<8x8xi32>
    %c0_i32_8 = arith.constant 0 : i32
    %28 = vector.broadcast %c0_i32_8 : i32 to vector<8x8xi32>
    %29 = arith.addi %28, %27 : vector<8x8xi32>
    %30 = vector.broadcast %26 : vector<8x1xi32> to vector<8x8xi32>
    %31 = arith.cmpi eq, %29, %30 : vector<8x8xi32>
    %32 = arith.extui %31 : vector<8x8xi1> to vector<8x8xi32>
    %33 = arith.sitofp %32 : vector<8x8xi32> to vector<8x8xf32>
    %34 = arith.truncf %33 : vector<8x8xf32> to vector<8x8xbf16>
    %c16 = arith.constant 16 : index
    %c0_9 = arith.constant 0 : index
    %35 = vector.load %arg3[%c16, %c0_9] : memref<24x128xbf16, #tpu.memory_space<vmem>>, vector<8x128xbf16>
    %cst_10 = arith.constant dense<0.000000e+00> : vector<8x128xf32>
    %36 = tpu.matmul %34, %35, %cst_10 {dimension_numbers = #tpu.dot_dimension_numbers<[1], [0], [0], [1], [0, 0, 1, 1], [], []>} : vector<8x8xbf16>, vector<8x128xbf16>, vector<8x128xf32> -> vector<8x128xf32>
    %37 = arith.addf %25, %36 : vector<8x128xf32>
    %c0_11 = arith.constant 0 : index
    %c0_12 = arith.constant 0 : index
    %38 = vector.load %arg4[%c0_11, %c0_12] : memref<8x128xf32, #tpu.memory_space<vmem>>, vector<8x128xf32>
    tpu.vector_store %arg4[%c0_11, %c0_12], %37 {strides = array<i32>} : memref<8x128xf32, #tpu.memory_space<vmem>>, vector<8x128xf32>,
    return
  }
  func.func @transform_0(%arg0: i32) -> (i32, i32) {
    %c0_i32 = arith.constant 0 : i32
    %c0_i32_0 = arith.constant 0 : i32
    return %arg0, %c0_i32 : i32, i32
  }
  func.func @transform_1(%arg0: i32) -> (i32, i32) {
    %c0_i32 = arith.constant 0 : i32
    %c0_i32_0 = arith.constant 0 : i32
    return %arg0, %c0_i32 : i32, i32
  }
  func.func @transform_2(%arg0: i32) -> (i32, i32) {
    %c0_i32 = arith.constant 0 : i32
    %c0_i32_0 = arith.constant 0 : i32
    %c0_i32_1 = arith.constant 0 : i32
    return %c0_i32, %c0_i32_0 : i32, i32
  }
  func.func @transform_3(%arg0: i32) -> (i32, i32) {
    %c0_i32 = arith.constant 0 : i32
    %c0_i32_0 = arith.constant 0 : i32
    return %arg0, %c0_i32 : i32, i32
  }
}

module attributes {stable_mosaic.version = 11 : i64} {
  func.func @kernel(%arg0: i32, %arg1: memref<8x128xf32, #tpu.memory_space<vmem>>, %arg2: memref<8x3xi32, #tpu.memory_space<vmem>>, %arg3: memref<24x128xbf16, #tpu.memory_space<vmem>>, %arg4: memref<8x128xf32, #tpu.memory_space<vmem>>) attributes {dimension_semantics = [#tpu.dimension_semantics<parallel>], iteration_bounds = array<i64: 2>, scalar_prefetch = 0 : i64, scratch_operands = 0 : i64, tpu.core_type = #tpu.core_type<tc>, window_params = [{transform_indices = @transform_0, window_bounds = array<i64: 8, 128>}, {transform_indices = @transform_1, window_bounds = array<i64: 8, 3>}, {pipeline_mode = #tpu.pipeline_mode<synchronous>, transform_indices = @transform_2, window_bounds = array<i64: 24, 128>}, {transform_indices = @transform_3, window_bounds = array<i64: 8, 128>}]} {
    %c0 = arith.constant 0 : index
    %c0_0 = arith.constant 0 : index
    %0 = vector.load %arg2[%c0, %c0_0] : memref<8x3xi32, #tpu.memory_space<vmem>>, vector<8x3xi32>
    %c0_1 = arith.constant 0 : index
    %c0_2 = arith.constant 0 : index
    %1 = vector.load %arg1[%c0_1, %c0_2] : memref<8x128xf32, #tpu.memory_space<vmem>>, vector<8x128xf32>
    %2 = vector.extract_strided_slice %0 {offsets = [0, 0], sizes = [8, 1], strides = [1, 1]} : vector<8x3xi32> to vector<8x1xi32>
    %3 = tpu.iota {dimensions = array<i32: 1>} : vector<8x8xi32>
    %c0_i32 = arith.constant 0 : i32
    %4 = vector.broadcast %c0_i32 : i32 to vector<8x8xi32>
    %5 = arith.addi %4, %3 : vector<8x8xi32>
    %6 = vector.broadcast %2 : vector<8x1xi32> to vector<8x8xi32>
    %7 = arith.cmpi eq, %5, %6 : vector<8x8xi32>
    %8 = arith.extui %7 : vector<8x8xi1> to vector<8x8xi32>
    %9 = arith.sitofp %8 : vector<8x8xi32> to vector<8x8xf32>
    %10 = arith.truncf %9 : vector<8x8xf32> to vector<8x8xbf16>
    %c0_3 = arith.constant 0 : index
    %c0_4 = arith.constant 0 : index
    %11 = vector.load %arg3[%c0_3, %c0_4] : memref<24x128xbf16, #tpu.memory_space<vmem>>, vector<8x128xbf16>
    %cst = arith.constant dense<0.000000e+00> : vector<8x128xf32>
    %12 = tpu.matmul %10, %11, %cst {dimension_numbers = #tpu.dot_dimension_numbers<[1], [0], [0], [1], [0, 0, 1, 1], [], []>} : vector<8x8xbf16>, vector<8x128xbf16>, vector<8x128xf32> -> vector<8x128xf32>
    %13 = arith.addf %1, %12 : vector<8x128xf32>
    %14 = vector.extract_strided_slice %0 {offsets = [0, 1], sizes = [8, 1], strides = [1, 1]} : vector<8x3xi32> to vector<8x1xi32>
    %15 = tpu.iota {dimensions = array<i32: 1>} : vector<8x8xi32>
    %c0_i32_5 = arith.constant 0 : i32
    %16 = vector.broadcast %c0_i32_5 : i32 to vector<8x8xi32>
    %17 = arith.addi %16, %15 : vector<8x8xi32>
    %18 = vector.broadcast %14 : vector<8x1xi32> to vector<8x8xi32>
    %19 = arith.cmpi eq, %17, %18 : vector<8x8xi32>
    %20 = arith.extui %19 : vector<8x8xi1> to vector<8x8xi32>
    %21 = arith.sitofp %20 : vector<8x8xi32> to vector<8x8xf32>
    %22 = arith.truncf %21 : vector<8x8xf32> to vector<8x8xbf16>
    %c8 = arith.constant 8 : index
    %c0_6 = arith.constant 0 : index
    %23 = vector.load %arg3[%c8, %c0_6] : memref<24x128xbf16, #tpu.memory_space<vmem>>, vector<8x128xbf16>
    %cst_7 = arith.constant dense<0.000000e+00> : vector<8x128xf32>
    %24 = tpu.matmul %22, %23, %cst_7 {dimension_numbers = #tpu.dot_dimension_numbers<[1], [0], [0], [1], [0, 0, 1, 1], [], []>} : vector<8x8xbf16>, vector<8x128xbf16>, vector<8x128xf32> -> vector<8x128xf32>
    %25 = arith.addf %13, %24 : vector<8x128xf32>
    %26 = vector.extract_strided_slice %0 {offsets = [0, 2], sizes = [8, 1], strides = [1, 1]} : vector<8x3xi32> to vector<8x1xi32>
    %27 = tpu.iota {dimensions = array<i32: 1>} : vector<8x8xi32>
    %c0_i32_8 = arith.constant 0 : i32
    %28 = vector.broadcast %c0_i32_8 : i32 to vector<8x8xi32>
    %29 = arith.addi %28, %27 : vector<8x8xi32>
    %30 = vector.broadcast %26 : vector<8x1xi32> to vector<8x8xi32>
    %31 = arith.cmpi eq, %29, %30 : vector<8x8xi32>
    %32 = arith.extui %31 : vector<8x8xi1> to vector<8x8xi32>
    %33 = arith.sitofp %32 : vector<8x8xi32> to vector<8x8xf32>
    %34 = arith.truncf %33 : vector<8x8xf32> to vector<8x8xbf16>
    %c16 = arith.constant 16 : index
    %c0_9 = arith.constant 0 : index
    %35 = vector.load %arg3[%c16, %c0_9] : memref<24x128xbf16, #tpu.memory_space<vmem>>, vector<8x128xbf16>
    %cst_10 = arith.constant dense<0.000000e+00> : vector<8x128xf32>
    %36 = tpu.matmul %34, %35, %cst_10 {dimension_numbers = #tpu.dot_dimension_numbers<[1], [0], [0], [1], [0, 0, 1, 1], [], []>} : vector<8x8xbf16>, vector<8x128xbf16>, vector<8x128xf32> -> vector<8x128xf32>
    %37 = arith.addf %25, %36 : vector<8x128xf32>
    %c0_11 = arith.constant 0 : index
    %c0_12 = arith.constant 0 : index
    %38 = vector.load %arg4[%c0_11, %c0_12] : memref<8x128xf32, #tpu.memory_space<vmem>>, vector<8x128xf32>
    tpu.vector_store %arg4[%c0_11, %c0_12], %37 {strides = array<i32>} : memref<8x128xf32, #tpu.memory_space<vmem>>, vector<8x128xf32>,
    return
  }
  func.func @transform_0(%arg0: i32) -> (i32, i32) {
    %c0_i32 = arith.constant 0 : i32
    %c0_i32_0 = arith.constant 0 : i32
    return %arg0, %c0_i32 : i32, i32
  }
  func.func @transform_1(%arg0: i32) -> (i32, i32) {
    %c0_i32 = arith.constant 0 : i32
    %c0_i32_0 = arith.constant 0 : i32
    return %arg0, %c0_i32 : i32, i32
  }
  func.func @transform_2(%arg0: i32) -> (i32, i32) {
    %c0_i32 = arith.constant 0 : i32
    %c0_i32_0 = arith.constant 0 : i32
    %c0_i32_1 = arith.constant 0 : i32
    return %c0_i32, %c0_i32_0 : i32, i32
  }
  func.func @transform_3(%arg0: i32) -> (i32, i32) {
    %c0_i32 = arith.constant 0 : i32
    %c0_i32_0 = arith.constant 0 : i32
    return %arg0, %c0_i32 : i32, i32
  }
}

</mosaic_0001>

<bundles_post_ra>
// kernel: tpu_custom_call.1
= control target key start
LH: loop header
LB: loop body
LE: loop exit
PB: predicated region body
PF: predicated region fallthrough
CT: control target
= control target key end

     0   :  { %8 = vsyncpa [#allocation3], 0  ;;  %s854_s0 = inlined_call_operand.vmem [shape: f32[16,128], index: 0, kind: input, shape index: {}]   ;;  %s855_s1 = inlined_call_operand.vmem [shape: s32[16,3], index: 1, kind: input, shape index: {}]   ;;  %s856_s2 = inlined_call_operand.hbm [shape: bf16[24,128], index: 2, kind: input, shape index: {}]   ;;  %s857_s3 = inlined_call_operand.hbm [shape: f32[16,128], index: 3, kind: output, shape index: {}]  }
   0x1   :  { %9 = vsyncpa [#allocation4], 0 }
   0x2   :  { %11 = vsyncpa [#allocation4 + $0x1], 0  ;;  %s703_s12 = smov 0   ;;  %s705_s13 = smov 0  }
   0x3   :  { %s707_s14 = smov 0   ;;  %s709_s15 = smov 0  }
   0x4 LB: > { %s724_s16 = sadd.s32 4294967295, %s672_s15   ;;  %s468_s17 = sadd.s32 4294967294, %s672_s15   ;;  %s672_s15 = sphi %s709_s15, %s873_s15   ;;  %s668_s14 = sphi %s707_s14, %s872_s14   ;;  %s664_s13 = sphi %s705_s13, %s871_s13   ;;  %s660_s12 = sphi %s703_s12, %s870_s12  }
   0x5   : > { %s728_s18 = sadd.s32 1, %s672_s15   ;;  %s97_s19 = sadd.s32 1, %s668_s14 }
   0x6   : > { %s94_s20 = ssub.s32 %s672_s15, %s728_s18  ;;  %p107_p0 = scmp.ne.s32.totalorder %s668_s14, %s664_s13 }
   0x7   : > { %p95_p1 = scmp.eq.s32.totalorder %s94_s20, 0  ;;  %p108_p2 = scmp.eq.s32.totalorder %s724_s16, 1 }
   0x8   : > { %p113_p3 = scmp.ne.s32.totalorder %s664_s13, %s660_s12  ;;  %p114_p4 = scmp.eq.s32.totalorder %s468_s17, 1 }
   0x9   : > { %s739_s21 = scalar_select %p95_p1, %s668_s14, %s97_s19  }
   0xa   : > { %p741_p5 = por %p108_p2, %p107_p0  ;;  %p745_p6 = por %p114_p4, %p113_p3 }
   0xb   : > { %p469_p7 = scmp.ge.s32.totalorder %s672_s15, 1  ;;  %p121_p8 = scmp.lt.s32.totalorder %s672_s15, 3 }
   0xc   : > { %s861_s22 = scalar_select %p741_p5, 1, 0 }
   0xd   : > { %s862_s23 = scalar_select %p745_p6, 1, 0 }
   0xe   : > { %p858_p9 = scmp.eq.s32.totalorder %s724_s16, 0  ;;  %p752_p10 = pnand %p469_p7, %p121_p8 }
   0xf   : > { %s674_s25 = smov [#allocation2]   ;;  %s578_s30 = scalar_lea.hbm %s856_s2, 192 }
  0x10   : > { %s863_s24 = scalar_select %p752_p10, 1, 0 }
  0x11   : > { %s133_s26 = sshll.u32 %s674_s25, 4  ;;  %p523_p11 = pneg %p752_p10  ;;  %s134_s26 = int_to_ptr.vmem [resolvable:$true] %s133_s26 }
  0x12   : > { %p579_p13 = scmp.ne.s32.totalorder %s856_s2, %s578_s30  ;;  %p585_p3 = scmp.lt.u32.totalorder %s578_s30, %s856_s2 }
  0x13   : > { %p760_p12 = pnand %p858_p9, %p523_p11 }
  0x15   : > { %p580_p0 = pneg %p760_p12 }
  0x17   : > { %p581_p1 = pnand %p580_p0, %p579_p13 }
  0x19   : > { %p582_p2 = pneg %p581_p1 }
  0x1b   : > { %p587_p4 = pnand %p585_p3, %p582_p2 }
  0x1d   : > { %590 = shalt.err (!%p587_p4)
}
  0x1e   : > { %s591_s8 = scalar_lea.vmem %s134_s26, 192  ;;  %p599_p9 = scmp.lt.s32.totalorder %s134_s26, %s134_s26 }
  0x1f   : > { %p592_p7 = scmp.ne.s32.totalorder %s134_s26, %s591_s8  ;;  %p600_p6 = scmp.lt.s32.totalorder %s591_s8, %s591_s8 }
  0x21   : > { %p594_p8 = pnand %p592_p7, %p580_p0  ;;  %p601_p5 = por %p600_p6, %p599_p9 }
  0x23   : > { %p595_p11 = pneg %p594_p8 }
  0x25   : > { %p602_p10 = pnand %p601_p5, %p595_p11 }
  0x27   : > { %605 = shalt.err (!%p602_p10)
}
  0x28   : > { %s675_s9 = smov 64   ;;  %s676_s10 = smov 4  }
  0x29   : > { %526 = dma.hbm_to_vmem [thread:$0]  (!%p760_p12), %s856_s2, 192, %s134_s26, [#allocation3], %s675_s9, %s675_s9, %s676_s10  }
  0x2a   : > { %p865_p13 = scmp.ne.s32.totalorder %s863_s24, 0 }
  0x2b   : > { %p866_p1 = scmp.eq.s32.totalorder (!%p865_p13), %s724_s16, 0 }
  0x2c   : > { %163 = sbr.rel (%p865_p13) target bundleno = 431 (0x1af), region = 32 }
  0x33   : > { %651 = dma.done.wait (%p866_p1), [#allocation3], 192   ;;  %p867_p0 = pmov %p866_p1 }
  0x34   : > { %p190_p5 = scmp.lt.s32.totalorder %s724_s16, 1  ;;  %v677_v0 = vmov 1   ;;  %v678_v1 = vmov 2   ;;  %v679_v2 = vmov 0.0   ;;  %vm215_vm0 = vcmask 1043456   ;;  %s187_s30 = sand.u32 1, %s664_s13  }
  0x35   : > { %653 = vsyncadd (%p867_p0), [#allocation3], 4294967104  ;;  %574 = vset.pattern.permute.xlu0 %v677_v0  ;;  %576 = vset.pattern.permute.xlu1 %v678_v1  ;;  %v267_v4 = vld [vmem:[#allocation2 + $0x4] sm:$0xf]  ;;  %vm680_vm1 = vmmov 0   ;;  %v681_v6 = vmov 0   ;;  %v201_v9 = vlaneseq }
  0x36   : > { %s788_s19 = scalar_select %p190_p5, %s724_s16, 1  ;;  %499 = vmatprep.subr.bf16.mxu0 %v679_v2  ;;  %493 = vmatprep.subr.bf16.mxu1 %v679_v2  ;;  %v272_v5 = vsel %vm215_vm0, %v267_v4, 0  ;;  %v210_v7 = vld [vmem:[#allocation2] sm:$0xf]  ;;  %v322_v12 = vld [vmem:[#allocation2 + $0x8] sm:$0xf] }
  0x37   : > { %500 = vmatpush3.bf16.msra.mxu0 %v272_v5  ;;  %501 = vmatprep.mubr.msk.bf16.mxu0 %vm680_vm1, %v679_v2  ;;  %v217_v8 = vsel %vm215_vm0, %v210_v7, 0  ;;  %v202_v10 = vand.u32 127, %v201_v9  ;;  %vm211_vm3 = vcmask 64512   ;;  %v327_v15 = vsel %vm215_vm0, %v322_v12, 0  ;;  %s474_s4 = sshll.u32 %s187_s30, 3  ;;  %s484_s5 = sshll.u32 %s724_s16, 7 }
  0x38   : > { %s475_s20 = sshll.u32 %s788_s19, 3  ;;  %505 = vmatprep.subr.bf16.mxu0 %v679_v2  ;;  %495 = vmatprep.mubr.msk.bf16.mxu1 %vm680_vm1, %v679_v2  ;;  %s189_s6 = scalar_lea.vmem [#allocation5], %s474_s4 }
  0x39   : > { %s197_s26 = scalar_lea.vmem %s855_s1, %s475_s20  ;;  %494 = vmatpush3.bf16.msra.mxu1 %v217_v8  ;;  %s193_s29 = scalar_lea.vmem %s854_s0, %s475_s20 }
  0x3a   : > { %v199_v3 = vld [vmem:[%s197_s26] sm:$0xff]  ;;  %s385_s7 = sshll.u32 %s189_s6, 4  ;;  %s812_s10 = scalar_lea.hbm %s857_s3, %s484_s5  ;;  %s814_s7 = int_to_ptr.vmem [resolvable:$true] %s385_s7 }
  0x3b   : > { %261 = vperm.xlu0 %574, %v199_v3   ;;  %316 = vperm.xlu1 %576, %v199_v3   ;;  %v200_v22 = vld [vmem:[%s193_s29] sm:$0xff]  ;;  %s372_s11 = scalar_lea.sflag [#allocation4], %s187_s30  ;;  %s606_s16 = scalar_lea.vmem %s814_s7, 128 }
  0x3c   : > { %p607_p6 = scmp.ne.s32.totalorder %s814_s7, %s606_s16  ;;  %p868_p9 = scmp.ne.s32.totalorder %s861_s22, 0 }
  0x3d   : > { %s682_s17 = smov [#allocation5]  }
  0x3e   : > { %p608_p10 = pnand %p607_p6, %p868_p9  ;;  %s610_s19 = sshll.u32 %s682_s17, 4  ;;  %s611_s19 = int_to_ptr.vmem [resolvable:$false] %s610_s19 }
  0x3f   : > { %575 = vset.pattern.permute.xlu0 %v681_v6  ;;  %s612_s20 = scalar_lea.vmem %s611_s19, 256  ;;  %p613_p2 = scmp.lt.s32.totalorder %s814_s7, %s611_s19 }
  0x40   : > { %204 = vperm.xlu0 %575, %v199_v3   ;;  %p609_p12 = pneg %p608_p10  ;;  %p614_p3 = scmp.lt.s32.totalorder %s612_s20, %s606_s16 }
  0x42   : > { %p615_p4 = por %p614_p3, %p613_p2 }
  0x44   : > { %577 = vset.pattern.permute.xlu0 %v678_v1  ;;  %p616_p7 = pnand %p615_p4, %p609_p12 }
  0xba   : > { %v262_v11 = vpop.permute.xlu0 %261  ;;  %v317_v16 = vpop.permute.xlu1 %316 }
  0xbb   : > { %vm263_vm2 = vcmp.eq.s32.totalorder %v202_v10, %v262_v11  ;;  %vm318_vm5 = vcmp.eq.s32.totalorder %v202_v10, %v317_v16 }
  0xbc   : > { %v479_v13 = vsel %vm263_vm2, 1.0, %v679_v2  ;;  %v481_v20 = vsel %vm318_vm5, 1.0, %v679_v2 }
  0xbd   : > { %v266_v14 = vpack.c.bf16 %v479_v13, %v479_v13  ;;  %v321_v21 = vpack.c.bf16 %v481_v20, %v481_v20 }
  0xbf   : > { %502 = vmatmul.mubr.msk.bf16.vlgmr.msra.gmra.mrb[0].mxu0 %vm211_vm3, %v266_v14  ;;  %v205_v17 = vpop.permute.xlu0 %204 }
  0xc0   : > { %506 = vmatpush3.bf16.msra.mxu0 %v327_v15  ;;  %vm206_vm4 = vcmp.eq.s32.totalorder %v202_v10, %v205_v17  ;;  %507 = vmatprep.mubr.msk.bf16.mxu0 %vm680_vm1, %v679_v2 }
  0xc1   : > { %v477_v18 = vsel %vm206_vm4, 1.0, %v679_v2 }
  0xc2   : > { %v209_v19 = vpack.c.bf16 %v477_v18, %v477_v18 }
  0xc4   : > { %496 = vmatmul.mubr.msk.bf16.vlgmr.msra.gmra.mrb[0].mxu1 %vm211_vm3, %v209_v19 }
  0xcb   : > { %508 = vmatmul.mubr.msk.bf16.vlgmr.msra.gmra.mrb[0].mxu0 %vm211_vm3, %v321_v21 }
 0x197   : > { %v253_v23 = vpop.f32.mrb[0].mxu1 }
 0x198   : > { %v259_v24 = vadd.f32 %v253_v23, %v200_v22  ;;  %v497_v25 = vpop.f32.mrb[1].mxu1 }
 0x199   : > { %v256_v26 = vpop.f32.mrb[2].mxu1 }
 0x19a   : > { %v498_v27 = vpop.f32.mrb[3].mxu1 }
 0x19e   : > { %v363_v28 = vpop.f32.mrb[0].mxu0 }
 0x19f   : > { %v512_v29 = vadd.f32 %v363_v28, %v259_v24  ;;  %v509_v30 = vpop.f32.mrb[1].mxu0 }
 0x1a0   : > { %v366_v31 = vpop.f32.mrb[2].mxu0 }
 0x1a1   : > { %370 = vst [vmem:[%s189_s6] sm:$0xff] %v512_v29  ;;  %v510_v32 = vpop.f32.mrb[3].mxu0 }
 0x1a2   : > { %619 = shalt.err (!%p616_p7)
}
 0x1a3   : > { %s620_s24 = scalar_lea.hbm %s812_s10, 128  ;;  %s624_s27 = scalar_lea.hbm %s857_s3, 256 }
 0x1a4   : > { %p621_p8 = scmp.ne.s32.totalorder %s812_s10, %s620_s24  ;;  %p625_p1 = scmp.lt.u32.totalorder %s812_s10, %s857_s3 }
 0x1a5   : > { %p626_p0 = scmp.lt.u32.totalorder %s624_s27, %s620_s24  ;;  %p628_p6 = scmp.lt.u32.totalorder %s620_s24, %s812_s10 }
 0x1a6   : > { %p622_p11 = pnand %p621_p8, %p868_p9 }
 0x1a7   : > { %p627_p5 = por %p626_p0, %p625_p1 }
 0x1a8   : > { %p623_p13 = pneg %p622_p11 }
 0x1a9   : > { %p629_p10 = por %p628_p6, %p627_p5 }
 0x1ab   : > { %p630_p12 = pnand %p629_p10, %p623_p13 }
 0x1ad   : > { %633 = shalt.err (!%p630_p12)
}
 0x1ae   : > { %521 = dma.vmem_to_hbm [thread:$0]  (%p868_p9), %s814_s7, 128, %s812_s10, %s372_s11  }
 0x1af PF: > { %p533_p2 = scmp.ge.s32.totalorder %s672_s15, 2  ;;  %s397_s30 = sand.u32 1, %s660_s12  }
 0x1b0   : > { %p869_p3 = scmp.ne.s32.totalorder %s862_s23, 0  ;;  %s398_s4 = scalar_lea.sflag [#allocation4], %s397_s30 }
 0x1b2   : > { %p528_p4 = pnand %p533_p2, %p869_p3 }
 0x1b4   : > { %655 = dma.done.wait (!%p528_p4), %s398_s4, 128  }
 0x1b5   : > { %657 = vsyncadd (!%p528_p4), %s398_s4, 4294967168  ;;  %p14_p7 = scmp.ge.s32.totalorder %s728_s18, 4   ;;  %s870_s12 = smov %s664_s13 }
 0x1b6   : > { %s871_s13 = smov %s668_s14  ;;  %s872_s14 = smov %s739_s21 }
 0x1b7   : > { %s873_s15 = smov %s728_s18  ;;  %16 = sbr.rel (!%p14_p7) target bundleno = 4 (0x4), region = 75 }
 0x1be   :  { %403 = vsyncpa [#allocation3], 1 }
 0x1bf   :  { %405 = vsyncpa [#allocation3 + $0x1], 1 }
 0x1c0   :  { %406 = vsyncpa [#allocation4], 1 }
 0x1c1   :  { %408 = vsyncpa [#allocation4 + $0x1], 1 }

// kernel: tpu_custom_call.1
= control target key start
LH: loop header
LB: loop body
LE: loop exit
PB: predicated region body
PF: predicated region fallthrough
CT: control target
= control target key end

     0   :  { %8 = vsyncpa [#allocation3], 0  ;;  %s854_s0 = inlined_call_operand.vmem [shape: f32[16,128], index: 0, kind: input, shape index: {}]   ;;  %s855_s1 = inlined_call_operand.vmem [shape: s32[16,3], index: 1, kind: input, shape index: {}]   ;;  %s856_s2 = inlined_call_operand.hbm [shape: bf16[24,128], index: 2, kind: input, shape index: {}]   ;;  %s857_s3 = inlined_call_operand.hbm [shape: f32[16,128], index: 3, kind: output, shape index: {}]  }
   0x1   :  { %9 = vsyncpa [#allocation4], 0 }
   0x2   :  { %11 = vsyncpa [#allocation4 + $0x1], 0  ;;  %s703_s12 = smov 0   ;;  %s705_s13 = smov 0  }
   0x3   :  { %s707_s14 = smov 0   ;;  %s709_s15 = smov 0  }
   0x4 LB: > { %s724_s16 = sadd.s32 4294967295, %s672_s15   ;;  %s468_s17 = sadd.s32 4294967294, %s672_s15   ;;  %s672_s15 = sphi %s709_s15, %s873_s15   ;;  %s668_s14 = sphi %s707_s14, %s872_s14   ;;  %s664_s13 = sphi %s705_s13, %s871_s13   ;;  %s660_s12 = sphi %s703_s12, %s870_s12  }
   0x5   : > { %s728_s18 = sadd.s32 1, %s672_s15   ;;  %s97_s19 = sadd.s32 1, %s668_s14 }
   0x6   : > { %s94_s20 = ssub.s32 %s672_s15, %s728_s18  ;;  %p107_p0 = scmp.ne.s32.totalorder %s668_s14, %s664_s13 }
   0x7   : > { %p95_p1 = scmp.eq.s32.totalorder %s94_s20, 0  ;;  %p108_p2 = scmp.eq.s32.totalorder %s724_s16, 1 }
   0x8   : > { %p113_p3 = scmp.ne.s32.totalorder %s664_s13, %s660_s12  ;;  %p114_p4 = scmp.eq.s32.totalorder %s468_s17, 1 }
   0x9   : > { %s739_s21 = scalar_select %p95_p1, %s668_s14, %s97_s19  }
   0xa   : > { %p741_p5 = por %p108_p2, %p107_p0  ;;  %p745_p6 = por %p114_p4, %p113_p3 }
   0xb   : > { %p469_p7 = scmp.ge.s32.totalorder %s672_s15, 1  ;;  %p121_p8 = scmp.lt.s32.totalorder %s672_s15, 3 }
   0xc   : > { %s861_s22 = scalar_select %p741_p5, 1, 0 }
   0xd   : > { %s862_s23 = scalar_select %p745_p6, 1, 0 }
   0xe   : > { %p858_p9 = scmp.eq.s32.totalorder %s724_s16, 0  ;;  %p752_p10 = pnand %p469_p7, %p121_p8 }
   0xf   : > { %s674_s25 = smov [#allocation2]   ;;  %s578_s30 = scalar_lea.hbm %s856_s2, 192 }
  0x10   : > { %s863_s24 = scalar_select %p752_p10, 1, 0 }
  0x11   : > { %s133_s26 = sshll.u32 %s674_s25, 4  ;;  %p523_p11 = pneg %p752_p10  ;;  %s134_s26 = int_to_ptr.vmem [resolvable:$true] %s133_s26 }
  0x12   : > { %p579_p13 = scmp.ne.s32.totalorder %s856_s2, %s578_s30  ;;  %p585_p3 = scmp.lt.u32.totalorder %s578_s30, %s856_s2 }
  0x13   : > { %p760_p12 = pnand %p858_p9, %p523_p11 }
  0x15   : > { %p580_p0 = pneg %p760_p12 }
  0x17   : > { %p581_p1 = pnand %p580_p0, %p579_p13 }
  0x19   : > { %p582_p2 = pneg %p581_p1 }
  0x1b   : > { %p587_p4 = pnand %p585_p3, %p582_p2 }
  0x1d   : > { %590 = shalt.err (!%p587_p4)
}
  0x1e   : > { %s591_s8 = scalar_lea.vmem %s134_s26, 192  ;;  %p599_p9 = scmp.lt.s32.totalorder %s134_s26, %s134_s26 }
  0x1f   : > { %p592_p7 = scmp.ne.s32.totalorder %s134_s26, %s591_s8  ;;  %p600_p6 = scmp.lt.s32.totalorder %s591_s8, %s591_s8 }
  0x21   : > { %p594_p8 = pnand %p592_p7, %p580_p0  ;;  %p601_p5 = por %p600_p6, %p599_p9 }
  0x23   : > { %p595_p11 = pneg %p594_p8 }
  0x25   : > { %p602_p10 = pnand %p601_p5, %p595_p11 }
  0x27   : > { %605 = shalt.err (!%p602_p10)
}
  0x28   : > { %s675_s9 = smov 64   ;;  %s676_s10 = smov 4  }
  0x29   : > { %526 = dma.hbm_to_vmem [thread:$0]  (!%p760_p12), %s856_s2, 192, %s134_s26, [#allocation3], %s675_s9, %s675_s9, %s676_s10  }
  0x2a   : > { %p865_p13 = scmp.ne.s32.totalorder %s863_s24, 0 }
  0x2b   : > { %p866_p1 = scmp.eq.s32.totalorder (!%p865_p13), %s724_s16, 0 }
  0x2c   : > { %163 = sbr.rel (%p865_p13) target bundleno = 431 (0x1af), region = 32 }
  0x33   : > { %651 = dma.done.wait (%p866_p1), [#allocation3], 192   ;;  %p867_p0 = pmov %p866_p1 }
  0x34   : > { %p190_p5 = scmp.lt.s32.totalorder %s724_s16, 1  ;;  %v677_v0 = vmov 1   ;;  %v678_v1 = vmov 2   ;;  %v679_v2 = vmov 0.0   ;;  %vm215_vm0 = vcmask 1043456   ;;  %s187_s30 = sand.u32 1, %s664_s13  }
  0x35   : > { %653 = vsyncadd (%p867_p0), [#allocation3], 4294967104  ;;  %574 = vset.pattern.permute.xlu0 %v677_v0  ;;  %576 = vset.pattern.permute.xlu1 %v678_v1  ;;  %v267_v4 = vld [vmem:[#allocation2 + $0x4] sm:$0xf]  ;;  %vm680_vm1 = vmmov 0   ;;  %v681_v6 = vmov 0   ;;  %v201_v9 = vlaneseq }
  0x36   : > { %s788_s19 = scalar_select %p190_p5, %s724_s16, 1  ;;  %499 = vmatprep.subr.bf16.mxu0 %v679_v2  ;;  %493 = vmatprep.subr.bf16.mxu1 %v679_v2  ;;  %v272_v5 = vsel %vm215_vm0, %v267_v4, 0  ;;  %v210_v7 = vld [vmem:[#allocation2] sm:$0xf]  ;;  %v322_v12 = vld [vmem:[#allocation2 + $0x8] sm:$0xf] }
  0x37   : > { %500 = vmatpush3.bf16.msra.mxu0 %v272_v5  ;;  %501 = vmatprep.mubr.msk.bf16.mxu0 %vm680_vm1, %v679_v2  ;;  %v217_v8 = vsel %vm215_vm0, %v210_v7, 0  ;;  %v202_v10 = vand.u32 127, %v201_v9  ;;  %vm211_vm3 = vcmask 64512   ;;  %v327_v15 = vsel %vm215_vm0, %v322_v12, 0  ;;  %s474_s4 = sshll.u32 %s187_s30, 3  ;;  %s484_s5 = sshll.u32 %s724_s16, 7 }
  0x38   : > { %s475_s20 = sshll.u32 %s788_s19, 3  ;;  %505 = vmatprep.subr.bf16.mxu0 %v679_v2  ;;  %495 = vmatprep.mubr.msk.bf16.mxu1 %vm680_vm1, %v679_v2  ;;  %s189_s6 = scalar_lea.vmem [#allocation5], %s474_s4 }
  0x39   : > { %s197_s26 = scalar_lea.vmem %s855_s1, %s475_s20  ;;  %494 = vmatpush3.bf16.msra.mxu1 %v217_v8  ;;  %s193_s29 = scalar_lea.vmem %s854_s0, %s475_s20 }
  0x3a   : > { %v199_v3 = vld [vmem:[%s197_s26] sm:$0xff]  ;;  %s385_s7 = sshll.u32 %s189_s6, 4  ;;  %s812_s10 = scalar_lea.hbm %s857_s3, %s484_s5  ;;  %s814_s7 = int_to_ptr.vmem [resolvable:$true] %s385_s7 }
  0x3b   : > { %261 = vperm.xlu0 %574, %v199_v3   ;;  %316 = vperm.xlu1 %576, %v199_v3   ;;  %v200_v22 = vld [vmem:[%s193_s29] sm:$0xff]  ;;  %s372_s11 = scalar_lea.sflag [#allocation4], %s187_s30  ;;  %s606_s16 = scalar_lea.vmem %s814_s7, 128 }
  0x3c   : > { %p607_p6 = scmp.ne.s32.totalorder %s814_s7, %s606_s16  ;;  %p868_p9 = scmp.ne.s32.totalorder %s861_s22, 0 }
  0x3d   : > { %s682_s17 = smov [#allocation5]  }
  0x3e   : > { %p608_p10 = pnand %p607_p6, %p868_p9  ;;  %s610_s19 = sshll.u32 %s682_s17, 4  ;;  %s611_s19 = int_to_ptr.vmem [resolvable:$false] %s610_s19 }
  0x3f   : > { %575 = vset.pattern.permute.xlu0 %v681_v6  ;;  %s612_s20 = scalar_lea.vmem %s611_s19, 256  ;;  %p613_p2 = scmp.lt.s32.totalorder %s814_s7, %s611_s19 }
  0x40   : > { %204 = vperm.xlu0 %575, %v199_v3   ;;  %p609_p12 = pneg %p608_p10  ;;  %p614_p3 = scmp.lt.s32.totalorder %s612_s20, %s606_s16 }
  0x42   : > { %p615_p4 = por %p614_p3, %p613_p2 }
  0x44   : > { %577 = vset.pattern.permute.xlu0 %v678_v1  ;;  %p616_p7 = pnand %p615_p4, %p609_p12 }
  0xba   : > { %v262_v11 = vpop.permute.xlu0 %261  ;;  %v317_v16 = vpop.permute.xlu1 %316 }
  0xbb   : > { %vm263_vm2 = vcmp.eq.s32.totalorder %v202_v10, %v262_v11  ;;  %vm318_vm5 = vcmp.eq.s32.totalorder %v202_v10, %v317_v16 }
  0xbc   : > { %v479_v13 = vsel %vm263_vm2, 1.0, %v679_v2  ;;  %v481_v20 = vsel %vm318_vm5, 1.0, %v679_v2 }
  0xbd   : > { %v266_v14 = vpack.c.bf16 %v479_v13, %v479_v13  ;;  %v321_v21 = vpack.c.bf16 %v481_v20, %v481_v20 }
  0xbf   : > { %502 = vmatmul.mubr.msk.bf16.vlgmr.msra.gmra.mrb[0].mxu0 %vm211_vm3, %v266_v14  ;;  %v205_v17 = vpop.permute.xlu0 %204 }
  0xc0   : > { %506 = vmatpush3.bf16.msra.mxu0 %v327_v15  ;;  %vm206_vm4 = vcmp.eq.s32.totalorder %v202_v10, %v205_v17  ;;  %507 = vmatprep.mubr.msk.bf16.mxu0 %vm680_vm1, %v679_v2 }
  0xc1   : > { %v477_v18 = vsel %vm206_vm4, 1.0, %v679_v2 }
  0xc2   : > { %v209_v19 = vpack.c.bf16 %v477_v18, %v477_v18 }
  0xc4   : > { %496 = vmatmul.mubr.msk.bf16.vlgmr.msra.gmra.mrb[0].mxu1 %vm211_vm3, %v209_v19 }
  0xcb   : > { %508 = vmatmul.mubr.msk.bf16.vlgmr.msra.gmra.mrb[0].mxu0 %vm211_vm3, %v321_v21 }
 0x197   : > { %v253_v23 = vpop.f32.mrb[0].mxu1 }
 0x198   : > { %v259_v24 = vadd.f32 %v253_v23, %v200_v22  ;;  %v497_v25 = vpop.f32.mrb[1].mxu1 }
 0x199   : > { %v256_v26 = vpop.f32.mrb[2].mxu1 }
 0x19a   : > { %v498_v27 = vpop.f32.mrb[3].mxu1 }
 0x19e   : > { %v363_v28 = vpop.f32.mrb[0].mxu0 }
 0x19f   : > { %v512_v29 = vadd.f32 %v363_v28, %v259_v24  ;;  %v509_v30 = vpop.f32.mrb[1].mxu0 }
 0x1a0   : > { %v366_v31 = vpop.f32.mrb[2].mxu0 }
 0x1a1   : > { %370 = vst [vmem:[%s189_s6] sm:$0xff] %v512_v29  ;;  %v510_v32 = vpop.f32.mrb[3].mxu0 }
 0x1a2   : > { %619 = shalt.err (!%p616_p7)
}
 0x1a3   : > { %s620_s24 = scalar_lea.hbm %s812_s10, 128  ;;  %s624_s27 = scalar_lea.hbm %s857_s3, 256 }
 0x1a4   : > { %p621_p8 = scmp.ne.s32.totalorder %s812_s10, %s620_s24  ;;  %p625_p1 = scmp.lt.u32.totalorder %s812_s10, %s857_s3 }
 0x1a5   : > { %p626_p0 = scmp.lt.u32.totalorder %s624_s27, %s620_s24  ;;  %p628_p6 = scmp.lt.u32.totalorder %s620_s24, %s812_s10 }
 0x1a6   : > { %p622_p11 = pnand %p621_p8, %p868_p9 }
 0x1a7   : > { %p627_p5 = por %p626_p0, %p625_p1 }
 0x1a8   : > { %p623_p13 = pneg %p622_p11 }
 0x1a9   : > { %p629_p10 = por %p628_p6, %p627_p5 }
 0x1ab   : > { %p630_p12 = pnand %p629_p10, %p623_p13 }
 0x1ad   : > { %633 = shalt.err (!%p630_p12)
}
 0x1ae   : > { %521 = dma.vmem_to_hbm [thread:$0]  (%p868_p9), %s814_s7, 128, %s812_s10, %s372_s11  }
 0x1af PF: > { %p533_p2 = scmp.ge.s32.totalorder %s672_s15, 2  ;;  %s397_s30 = sand.u32 1, %s660_s12  }
 0x1b0   : > { %p869_p3 = scmp.ne.s32.totalorder %s862_s23, 0  ;;  %s398_s4 = scalar_lea.sflag [#allocation4], %s397_s30 }
 0x1b2   : > { %p528_p4 = pnand %p533_p2, %p869_p3 }
 0x1b4   : > { %655 = dma.done.wait (!%p528_p4), %s398_s4, 128  }
 0x1b5   : > { %657 = vsyncadd (!%p528_p4), %s398_s4, 4294967168  ;;  %p14_p7 = scmp.ge.s32.totalorder %s728_s18, 4   ;;  %s870_s12 = smov %s664_s13 }
 0x1b6   : > { %s871_s13 = smov %s668_s14  ;;  %s872_s14 = smov %s739_s21 }
 0x1b7   : > { %s873_s15 = smov %s728_s18  ;;  %16 = sbr.rel (!%p14_p7) target bundleno = 4 (0x4), region = 75 }
 0x1be   :  { %403 = vsyncpa [#allocation3], 1 }
 0x1bf   :  { %405 = vsyncpa [#allocation3 + $0x1], 1 }
 0x1c0   :  { %406 = vsyncpa [#allocation4], 1 }
 0x1c1   :  { %408 = vsyncpa [#allocation4 + $0x1], 1 }

</bundles_post_ra>
